<compile_context>
chip_gen: v7x
topology: tpu7x:2x2x1
jax: 0.10.0
libtpu: 0.0.40
codegen_flags: <defaults>
</compile_context>

<pallas_src>
import jax
import jax.numpy as jnp
from jax.experimental import pallas as pl
from jax.experimental.pallas import tpu as pltpu


def _round_up(x, m):
    return ((x + m - 1) // m) * m


def _linear_kernel(x_ref, w_ref, b_ref, o_ref):
    # x: [tm, Kp] bf16, w: [Kp, Np] bf16, b: [1, Np] f32  ->  o: [tm, Np] f32
    acc = jnp.dot(x_ref[...], w_ref[...], preferred_element_type=jnp.float32)
    o_ref[...] = (acc + b_ref[...]).astype(o_ref.dtype)


def linear_pallas(x2d, w_t, b, *, tm=1024, mxu_dtype=jnp.bfloat16):
    """y = x2d @ w_t + b with lane-dense padding and an M-tiled Pallas grid."""
    M, Fin = x2d.shape
    Fout = w_t.shape[1]

    # Lane-dense padding: K and Fout up to multiples of 128; M up to a multiple
    # of the row tile (itself a multiple of 256 -> full MXU passes, no masked
    # sublanes for bf16).
    Kp = _round_up(Fin, 128)
    Np = _round_up(Fout, 128)
    tm_eff = min(tm, _round_up(M, 256))
    Mp = _round_up(M, tm_eff)

    xp = jnp.zeros((Mp, Kp), mxu_dtype).at[:M, :Fin].set(x2d.astype(mxu_dtype))
    wp = jnp.zeros((Kp, Np), mxu_dtype).at[:Fin, :Fout].set(w_t.astype(mxu_dtype))
    bp = jnp.zeros((1, Np), jnp.float32).at[0, :Fout].set(b.astype(jnp.float32))

    grid_m = Mp // tm_eff
    cost = pl.CostEstimate(
        flops=2 * Mp * Kp * Np,
        transcendentals=0,
        bytes_accessed=(Mp * Kp * xp.dtype.itemsize
                        + Kp * Np * wp.dtype.itemsize
                        + Mp * Np * 4),
    )

    yp = pl.pallas_call(
        _linear_kernel,
        out_shape=jax.ShapeDtypeStruct((Mp, Np), jnp.float32),
        grid=(grid_m,),
        in_specs=[
            # x tiles march over M; weight/bias index_maps are constant so the
            # (tiny) weight stays VMEM-resident across all grid steps.
            pl.BlockSpec((tm_eff, Kp), lambda i: (i, 0)),
            pl.BlockSpec((Kp, Np), lambda i: (0, 0)),
            pl.BlockSpec((1, Np), lambda i: (0, 0)),
        ],
        out_specs=pl.BlockSpec((tm_eff, Np), lambda i: (i, 0)),
        compiler_params=pltpu.CompilerParams(
            dimension_semantics=("parallel",)),
        cost_estimate=cost,
    )(xp, wp, bp)

    # Slice the padding back off; return in the caller's dtype.
    return yp[:M, :Fout].astype(x2d.dtype)


class VSAPallas:
    """JAX/Pallas re-implementation of the (defined portion of) VSA.forward."""

    def __init__(self, d_model, heads, num_encoder_layers, key):
        self.d_model = d_model
        self.heads = heads
        self.num_encoder_layers = num_encoder_layers

        k_fc_w, k_fc_b, k_out_w, k_out_b = jax.random.split(key, 4)

        # nn.Linear(66, d_model): PyTorch default init U(-1/sqrt(fan_in), +)
        bound_fc = 1.0 / jnp.sqrt(66.0)
        # stored pre-transposed: [Fin, Fout]
        self.fc_w_t = jax.random.uniform(
            k_fc_w, (66, d_model), jnp.float32, -bound_fc, bound_fc)
        self.fc_b = jax.random.uniform(
            k_fc_b, (d_model,), jnp.float32, -bound_fc, bound_fc)

        # nn.Linear(d_model, 66): constructed in __init__ but unused in forward
        bound_out = 1.0 / jnp.sqrt(float(d_model))
        self.out_w_t = jax.random.uniform(
            k_out_w, (d_model, 66), jnp.float32, -bound_out, bound_out)
        self.out_b = jax.random.uniform(
            k_out_b, (66,), jnp.float32, -bound_out, bound_out)

    def __call__(self, x, adj, s_adj):
        B, N, Fin = x.shape
        assert Fin == 66
        # Batch all (B, N) rows into one M-tiled pallas_call so the projection
        # is a single lane-dense matmul rather than many tiny dispatches.
        x2d = x.reshape(B * N, Fin)
        y2d = linear_pallas(x2d, self.fc_w_t, self.fc_b)
        y = y2d.reshape(B, N, self.d_model)
        # TODO(synk): `vsa_layer(heads, d_model)` is not defined in the provided
        # reference source, so the encoder stack `for net in self.vsa_layer:
        # x = net(x, adj, s_adj)` cannot be faithfully reproduced; it is left
        # as identity here (adj / s_adj are accepted but unused).
        del adj, s_adj
        return y


if __name__ == "__main__":
    key = jax.random.PRNGKey(0)
    k_model, k_x, k_adj, k_sadj = jax.random.split(key, 4)

    B, N = 2, 8           # batch of 2 graphs, 8 nodes each
    d_model, heads, layers = 32, 4, 2

    model = VSAPallas(d_model, heads, layers, k_model)

    x = jax.random.normal(k_x, (B, N, 66), jnp.float32)
    adj = (jax.random.uniform(k_adj, (B, N, N)) > 0.5).astype(jnp.float32)
    s_adj = (jax.random.uniform(k_sadj, (B, N, N)) > 0.5).astype(jnp.float32)

    y = model(x, adj, s_adj)
    y = jax.block_until_ready(y)
    assert y.shape == (B, N, d_model)

    # Correctness check of the Pallas hot path vs plain JAX.  The kernel feeds
    # bf16 to the MXU (f32 accumulate), so compare against the bf16-rounded-
    # input reference; residual error is only accumulation-order noise.
    x_bf = x.reshape(B * N, 66).astype(jnp.bfloat16).astype(jnp.float32)
    w_bf = model.fc_w_t.astype(jnp.bfloat16).astype(jnp.float32)
    y_ref = (x_bf @ w_bf + model.fc_b).reshape(B, N, d_model)
    assert jnp.allclose(y, y_ref, atol=1e-3, rtol=1e-3)

    # Also confirm we are close to the exact f32 math (bf16 rounding only).
    y_f32 = (x.reshape(B * N, 66) @ model.fc_w_t + model.fc_b).reshape(B, N, d_model)
    assert jnp.allclose(y, y_f32, atol=5e-2, rtol=5e-2)

    print("KERNEL_OK")
</pallas_src>

<mosaic_0001>
module attributes {stable_mosaic.version = 11 : i64} {
  func.func @_linear_kernel(%arg0: i32, %arg1: memref<256x128xbf16, #tpu.memory_space<vmem>>, %arg2: memref<128x128xbf16, #tpu.memory_space<vmem>>, %arg3: memref<1x128xf32, #tpu.memory_space<vmem>>, %arg4: memref<256x128xf32, #tpu.memory_space<vmem>>) attributes {dimension_semantics = [#tpu.dimension_semantics<parallel>], iteration_bounds = array<i64: 1>, scalar_prefetch = 0 : i64, scratch_operands = 0 : i64, tpu.core_type = #tpu.core_type<tc>, window_params = [{transform_indices = @transform_0, window_bounds = array<i64: 256, 128>}, {pipeline_mode = #tpu.pipeline_mode<synchronous>, transform_indices = @transform_1, window_bounds = array<i64: 128, 128>}, {pipeline_mode = #tpu.pipeline_mode<synchronous>, transform_indices = @transform_2, window_bounds = array<i64: 1, 128>}, {transform_indices = @transform_3, window_bounds = array<i64: 256, 128>}]} {
    %c0 = arith.constant 0 : index
    %c0_0 = arith.constant 0 : index
    %0 = vector.load %arg1[%c0, %c0_0] : memref<256x128xbf16, #tpu.memory_space<vmem>>, vector<256x128xbf16>
    %c0_1 = arith.constant 0 : index
    %c0_2 = arith.constant 0 : index
    %1 = vector.load %arg2[%c0_1, %c0_2] : memref<128x128xbf16, #tpu.memory_space<vmem>>, vector<128x128xbf16>
    %cst = arith.constant dense<0.000000e+00> : vector<256x128xf32>
    %2 = tpu.matmul %0, %1, %cst {dimension_numbers = #tpu.dot_dimension_numbers<[1], [0], [0], [1], [0, 0, 1, 1], [], []>} : vector<256x128xbf16>, vector<128x128xbf16>, vector<256x128xf32> -> vector<256x128xf32>
    %c0_3 = arith.constant 0 : index
    %c0_4 = arith.constant 0 : index
    %3 = vector.load %arg3[%c0_3, %c0_4] : memref<1x128xf32, #tpu.memory_space<vmem>>, vector<1x128xf32>
    %4 = vector.broadcast %3 : vector<1x128xf32> to vector<256x128xf32>
    %5 = arith.addf %2, %4 : vector<256x128xf32>
    %c0_5 = arith.constant 0 : index
    %c0_6 = arith.constant 0 : index
    %6 = vector.load %arg4[%c0_5, %c0_6] : memref<256x128xf32, #tpu.memory_space<vmem>>, vector<256x128xf32>
    tpu.vector_store %arg4[%c0_5, %c0_6], %5 {strides = array<i32>} : memref<256x128xf32, #tpu.memory_space<vmem>>, vector<256x128xf32>,
    return
  }
  func.func @transform_0(%arg0: i32) -> (i32, i32) {
    %c0_i32 = arith.constant 0 : i32
    %c0_i32_0 = arith.constant 0 : i32
    return %arg0, %c0_i32 : i32, i32
  }
  func.func @transform_1(%arg0: i32) -> (i32, i32) {
    %c0_i32 = arith.constant 0 : i32
    %c0_i32_0 = arith.constant 0 : i32
    %c0_i32_1 = arith.constant 0 : i32
    return %c0_i32, %c0_i32_0 : i32, i32
  }
  func.func @transform_2(%arg0: i32) -> (i32, i32) {
    %c0_i32 = arith.constant 0 : i32
    %c0_i32_0 = arith.constant 0 : i32
    %c0_i32_1 = arith.constant 0 : i32
    return %c0_i32, %c0_i32_0 : i32, i32
  }
  func.func @transform_3(%arg0: i32) -> (i32, i32) {
    %c0_i32 = arith.constant 0 : i32
    %c0_i32_0 = arith.constant 0 : i32
    return %arg0, %c0_i32 : i32, i32
  }
}

</mosaic_0001>

<bundles_post_ra>
// kernel: tpu_custom_call.1
= control target key start
LH: loop header
LB: loop body
LE: loop exit
PB: predicated region body
PF: predicated region fallthrough
CT: control target
= control target key end

     0   :  { %8 = vsyncpa [#allocation3], 0  ;;  %s770_s0 = inlined_call_operand.hbm [shape: bf16[256,128], index: 0, kind: input, shape index: {}]   ;;  %s771_s1 = inlined_call_operand.hbm [shape: bf16[128,128], index: 1, kind: input, shape index: {}]   ;;  %s772_s2 = inlined_call_operand.vmem [shape: f32[1,128], index: 2, kind: input, shape index: {}]   ;;  %s773_s3 = inlined_call_operand.hbm [shape: f32[256,128], index: 3, kind: output, shape index: {}]  }
   0x1   :  { %9 = vsyncpa [#allocation6], 0 }
   0x2   :  { %10 = vsyncpa [#allocation4], 0  ;;  %s670_s12 = smov [#allocation2]   ;;  %s598_s16 = scalar_lea.hbm %s770_s0, 2048 }
   0x3   :  { %s16_s13 = sshll.u32 %s670_s12, 4  ;;  %p599_p0 = scmp.ne.s32.totalorder %s770_s0, %s598_s16  ;;  %s17_s13 = int_to_ptr.vmem [resolvable:$true] %s16_s13 }
   0x4   :  { %p602_p1 = scmp.lt.u32.totalorder %s598_s16, %s770_s0 }
   0x6   :  { %p604_p2 = pnand %p602_p1, %p599_p0 }
   0x8   :  { %607 = shalt.err (!%p604_p2)
}
   0x9   :  { %s608_s21 = scalar_lea.vmem %s17_s13, 2048  ;;  %p613_p4 = scmp.lt.s32.totalorder %s17_s13, %s17_s13 }
   0xa   :  { %p609_p3 = scmp.ne.s32.totalorder %s17_s13, %s608_s21  ;;  %p614_p5 = scmp.lt.s32.totalorder %s608_s21, %s608_s21 }
   0xc   :  { %p615_p6 = por %p614_p5, %p613_p4 }
   0xe   :  { %p616_p7 = pnand %p615_p6, %p609_p3 }
  0x10   :  { %619 = shalt.err (!%p616_p7)
}
  0x11   :  { %s671_s22 = smov 64   ;;  %s672_s23 = smov 4  }
  0x12   :  { %22 = dma.hbm_to_vmem [thread:$0]  %s770_s0, 2048, %s17_s13, [#allocation3], %s671_s22, %s671_s22, %s672_s23  }
  0x13   :  { %s673_s26 = smov [#allocation5]   ;;  %s620_s30 = scalar_lea.hbm %s771_s1, 1024 }
  0x14   :  { %s28_s27 = sshll.u32 %s673_s26, 4  ;;  %p621_p8 = scmp.ne.s32.totalorder %s771_s1, %s620_s30  ;;  %s29_s27 = int_to_ptr.vmem [resolvable:$true] %s28_s27 }
  0x15   :  { %p624_p9 = scmp.lt.u32.totalorder %s620_s30, %s771_s1 }
  0x17   :  { %p626_p10 = pnand %p624_p9, %p621_p8 }
  0x19   :  { %629 = shalt.err (!%p626_p10)
}
  0x1a   :  { %s630_s8 = scalar_lea.vmem %s29_s27, 1024  ;;  %p635_p12 = scmp.lt.s32.totalorder %s29_s27, %s29_s27 }
  0x1b   :  { %p631_p11 = scmp.ne.s32.totalorder %s29_s27, %s630_s8  ;;  %p636_p13 = scmp.lt.s32.totalorder %s630_s8, %s630_s8 }
  0x1d   :  { %p637_p0 = por %p636_p13, %p635_p12 }
  0x1f   :  { %p638_p1 = pnand %p637_p0, %p631_p11 }
  0x21   :  { %641 = shalt.err (!%p638_p1)
}
  0x22   :  { %34 = dma.hbm_to_vmem [thread:$0]  %s771_s1, 1024, %s29_s27, [#allocation6], %s671_s22, %s671_s22, %s672_s23  }
  0x23   :  { %664 = dma.done.wait [#allocation3], 2048  }
  0x24   :  { %665 = vsyncadd [#allocation3], 4294965248 }
  0x25   :  { %666 = dma.done.wait [#allocation6], 1024  }
  0x26   :  { %667 = vsyncadd [#allocation6], 4294966272  ;;  %v574_v0 = vld [vmem:[#allocation5] sm:$0xff]   ;;  %v575_v1 = vld [vmem:[#allocation5 + $0x8] sm:$0xff]  }
  0x27   :  { %503 = vmatprep.subr.bf16.mxu0 %v574_v0  ;;  %551 = vmatprep.subr.bf16.mxu1 %v574_v0  ;;  %v576_v2 = vld [vmem:[#allocation5 + $0x10] sm:$0xff]   ;;  %v577_v3 = vld [vmem:[#allocation5 + $0x18] sm:$0xff]   ;;  %v582_v4 = vld [vmem:[#allocation2] sm:$0xff]  }
  0x28   :  { %504 = vmatpush3.bf16.msra.mxu0 %v574_v0  ;;  %559 = vmatpush3.bf16.msra.mxu1 %v574_v0  ;;  %v583_v5 = vld [vmem:[#allocation2 + $0x40] sm:$0xff]   ;;  %v579_v7 = vld [vmem:[#allocation5 + $0x28] sm:$0xff]   ;;  %v580_v8 = vld [vmem:[#allocation5 + $0x30] sm:$0xff]  }
  0x29   :  { %505 = vmatprep.subr.bf16.mxu0 %v575_v1  ;;  %552 = vmatprep.subr.bf16.mxu1 %v575_v1  ;;  %v578_v6 = vld [vmem:[#allocation5 + $0x20] sm:$0xff]   ;;  %v581_v9 = vld [vmem:[#allocation5 + $0x38] sm:$0xff]   ;;  %v584_v10 = vld [vmem:[#allocation2 + $0x8] sm:$0xff]  }
  0x2a   :  { %519 = vmatprep.mubr.bf16.mxu0 %v582_v4  ;;  %535 = vmatprep.mubr.bf16.mxu1 %v583_v5  ;;  %v585_v11 = vld [vmem:[#allocation2 + $0x48] sm:$0xff]   ;;  %v586_v12 = vld [vmem:[#allocation2 + $0x10] sm:$0xff]   ;;  %v588_v14 = vld [vmem:[#allocation2 + $0x18] sm:$0xff]  }
  0x2b   :  { %v587_v13 = vld [vmem:[#allocation2 + $0x50] sm:$0xff]   ;;  %v589_v15 = vld [vmem:[#allocation2 + $0x58] sm:$0xff]   ;;  %v590_v16 = vld [vmem:[#allocation2 + $0x20] sm:$0xff]  }
  0x2c   :  { %506 = vmatpush3.bf16.msra.mxu0 %v575_v1  ;;  %560 = vmatpush3.bf16.msra.mxu1 %v575_v1  ;;  %v591_v17 = vld [vmem:[#allocation2 + $0x60] sm:$0xff]   ;;  %v592_v18 = vld [vmem:[#allocation2 + $0x28] sm:$0xff]   ;;  %v594_v20 = vld [vmem:[#allocation2 + $0x30] sm:$0xff]  }
  0x2d   :  { %507 = vmatprep.subr.bf16.mxu0 %v576_v2  ;;  %553 = vmatprep.subr.bf16.mxu1 %v576_v2  ;;  %v593_v19 = vld [vmem:[#allocation2 + $0x68] sm:$0xff]   ;;  %v595_v21 = vld [vmem:[#allocation2 + $0x70] sm:$0xff]   ;;  %v596_v22 = vld [vmem:[#allocation2 + $0x38] sm:$0xff]  }
  0x2e   :  { %v597_v23 = vld [vmem:[#allocation2 + $0x78] sm:$0xff]   ;;  %v724_v24 = vld [vmem:[%s772_s2] ss:$0 sm:$0xff]  ;;  %s674_s2 = smov [#allocation7]  }
  0x2f   :  { %s441_s11 = sshll.u32 %s674_s2, 4  ;;  %s442_s11 = int_to_ptr.vmem [resolvable:$true] %s441_s11 }
  0x30   :  { %508 = vmatpush3.bf16.msra.mxu0 %v576_v2  ;;  %561 = vmatpush3.bf16.msra.mxu1 %v576_v2  ;;  %s642_s12 = scalar_lea.vmem %s442_s11, 4096  ;;  %p647_p3 = scmp.lt.s32.totalorder %s442_s11, %s442_s11 }
  0x31   :  { %509 = vmatprep.subr.bf16.mxu0 %v577_v3  ;;  %554 = vmatprep.subr.bf16.mxu1 %v577_v3  ;;  %p643_p2 = scmp.ne.s32.totalorder %s442_s11, %s642_s12  ;;  %p648_p4 = scmp.lt.s32.totalorder %s642_s12, %s642_s12 }
  0x33   :  { %p649_p5 = por %p648_p4, %p647_p3 }
  0x34   :  { %510 = vmatpush3.bf16.msra.mxu0 %v577_v3  ;;  %562 = vmatpush3.bf16.msra.mxu1 %v577_v3 }
  0x35   :  { %511 = vmatprep.subr.bf16.mxu0 %v578_v6  ;;  %555 = vmatprep.subr.bf16.mxu1 %v578_v6  ;;  %p650_p6 = pnand %p649_p5, %p643_p2 }
  0x38   :  { %512 = vmatpush3.bf16.msra.mxu0 %v578_v6  ;;  %563 = vmatpush3.bf16.msra.mxu1 %v578_v6 }
  0x39   :  { %513 = vmatprep.subr.bf16.mxu0 %v579_v7  ;;  %556 = vmatprep.subr.bf16.mxu1 %v579_v7 }
  0x3c   :  { %514 = vmatpush3.bf16.msra.mxu0 %v579_v7  ;;  %564 = vmatpush3.bf16.msra.mxu1 %v579_v7 }
  0x3d   :  { %515 = vmatprep.subr.bf16.mxu0 %v580_v8  ;;  %557 = vmatprep.subr.bf16.mxu1 %v580_v8 }
  0x40   :  { %516 = vmatpush3.bf16.msra.mxu0 %v580_v8  ;;  %565 = vmatpush3.bf16.msra.mxu1 %v580_v8 }
  0x41   :  { %517 = vmatprep.subr.bf16.mxu0 %v581_v9  ;;  %558 = vmatprep.subr.bf16.mxu1 %v581_v9 }
  0x44   :  { %518 = vmatpush3.bf16.msra.mxu0 %v581_v9  ;;  %566 = vmatpush3.bf16.msra.mxu1 %v581_v9 }
  0x47   :  { %520 = vmatmul.mubr.bf16.vlgmr.msra.gmra.mrb[0].mxu0 %v584_v10  ;;  %536 = vmatmul.mubr.bf16.vlgmr.msra.gmra.mrb[0].mxu1 %v585_v11 }
  0x48   :  { %523 = vmatprep.mubr.bf16.mxu0 %v586_v12  ;;  %539 = vmatprep.mubr.bf16.mxu1 %v587_v13 }
  0x4f   :  { %524 = vmatmul.mubr.bf16.gmra.mrb[4].mxu0 %v588_v14  ;;  %540 = vmatmul.mubr.bf16.gmra.mrb[4].mxu1 %v589_v15 }
  0x50   :  { %527 = vmatprep.mubr.bf16.mxu0 %v590_v16  ;;  %543 = vmatprep.mubr.bf16.mxu1 %v591_v17 }
  0x57   :  { %528 = vmatmul.mubr.bf16.gmra.mrb[8].mxu0 %v592_v18  ;;  %544 = vmatmul.mubr.bf16.gmra.mrb[8].mxu1 %v593_v19 }
  0x58   :  { %531 = vmatprep.mubr.bf16.mxu0 %v594_v20  ;;  %547 = vmatprep.mubr.bf16.mxu1 %v595_v21 }
  0x5f   :  { %532 = vmatmul.mubr.bf16.gmra.mrb[12].mxu0 %v596_v22  ;;  %548 = vmatmul.mubr.bf16.gmra.mrb[12].mxu1 %v597_v23 }
 0x11a   :  { %v521_v25 = vpop.f32.mrb[0].mxu0  ;;  %v537_v26 = vpop.f32.mrb[0].mxu1 }
 0x11b   :  { %v286_v27 = vadd.f32 %v521_v25, %v724_v24  ;;  %v350_v28 = vadd.f32 %v537_v26, %v724_v24  ;;  %v277_v29 = vpop.f32.mrb[1].mxu0  ;;  %v341_v30 = vpop.f32.mrb[1].mxu1 }
 0x11c   :  { %v278_v31 = vadd.f32 %v724_v24, %v277_v29  ;;  %v342_v32 = vadd.f32 %v724_v24, %v341_v30  ;;  %v522_v33 = vpop.f32.mrb[2].mxu0  ;;  %v538_v34 = vpop.f32.mrb[2].mxu1 }
 0x11d   :  { %406 = vst [vmem:[#allocation7 + $0x10] sm:$0xff] %v286_v27  ;;  %422 = vst [vmem:[#allocation7 + $0x90] sm:$0xff] %v350_v28  ;;  %v289_v35 = vadd.f32 %v522_v33, %v724_v24  ;;  %v353_v36 = vadd.f32 %v538_v34, %v724_v24  ;;  %v280_v37 = vpop.f32.mrb[3].mxu0  ;;  %v344_v38 = vpop.f32.mrb[3].mxu1 }
 0x11e   :  { %404 = vst [vmem:[#allocation7] sm:$0xff] %v278_v31  ;;  %420 = vst [vmem:[#allocation7 + $0x80] sm:$0xff] %v342_v32  ;;  %v281_v39 = vadd.f32 %v724_v24, %v280_v37  ;;  %v345_v40 = vadd.f32 %v724_v24, %v344_v38 }
 0x11f   :  { %407 = vst [vmem:[#allocation7 + $0x18] sm:$0xff] %v289_v35  ;;  %423 = vst [vmem:[#allocation7 + $0x98] sm:$0xff] %v353_v36 }
 0x120   :  { %405 = vst [vmem:[#allocation7 + $0x8] sm:$0xff] %v281_v39  ;;  %421 = vst [vmem:[#allocation7 + $0x88] sm:$0xff] %v345_v40 }
 0x122   :  { %v525_v41 = vpop.f32.mrb[4].mxu0  ;;  %v541_v42 = vpop.f32.mrb[4].mxu1 }
 0x123   :  { %v302_v43 = vadd.f32 %v525_v41, %v724_v24  ;;  %v366_v44 = vadd.f32 %v541_v42, %v724_v24  ;;  %v293_v45 = vpop.f32.mrb[5].mxu0  ;;  %v357_v46 = vpop.f32.mrb[5].mxu1 }
 0x124   :  { %v294_v47 = vadd.f32 %v724_v24, %v293_v45  ;;  %v358_v48 = vadd.f32 %v724_v24, %v357_v46  ;;  %v526_v49 = vpop.f32.mrb[6].mxu0  ;;  %v542_v50 = vpop.f32.mrb[6].mxu1 }
 0x125   :  { %410 = vst [vmem:[#allocation7 + $0x30] sm:$0xff] %v302_v43  ;;  %426 = vst [vmem:[#allocation7 + $0xb0] sm:$0xff] %v366_v44  ;;  %v305_v51 = vadd.f32 %v526_v49, %v724_v24  ;;  %v369_v52 = vadd.f32 %v542_v50, %v724_v24  ;;  %v296_v53 = vpop.f32.mrb[7].mxu0  ;;  %v360_v54 = vpop.f32.mrb[7].mxu1 }
 0x126   :  { %408 = vst [vmem:[#allocation7 + $0x20] sm:$0xff] %v294_v47  ;;  %424 = vst [vmem:[#allocation7 + $0xa0] sm:$0xff] %v358_v48  ;;  %v297_v55 = vadd.f32 %v724_v24, %v296_v53  ;;  %v361_v56 = vadd.f32 %v724_v24, %v360_v54 }
 0x127   :  { %411 = vst [vmem:[#allocation7 + $0x38] sm:$0xff] %v305_v51  ;;  %427 = vst [vmem:[#allocation7 + $0xb8] sm:$0xff] %v369_v52 }
 0x128   :  { %409 = vst [vmem:[#allocation7 + $0x28] sm:$0xff] %v297_v55  ;;  %425 = vst [vmem:[#allocation7 + $0xa8] sm:$0xff] %v361_v56 }
 0x12a   :  { %v529_v57 = vpop.f32.mrb[8].mxu0  ;;  %v545_v58 = vpop.f32.mrb[8].mxu1 }
 0x12b   :  { %v318_v59 = vadd.f32 %v529_v57, %v724_v24  ;;  %v382_v60 = vadd.f32 %v545_v58, %v724_v24  ;;  %v309_v61 = vpop.f32.mrb[9].mxu0  ;;  %v373_v62 = vpop.f32.mrb[9].mxu1 }
 0x12c   :  { %v310_v63 = vadd.f32 %v724_v24, %v309_v61  ;;  %v374_v0 = vadd.f32 %v724_v24, %v373_v62  ;;  %v530_v1 = vpop.f32.mrb[10].mxu0  ;;  %v546_v2 = vpop.f32.mrb[10].mxu1 }
 0x12d   :  { %414 = vst [vmem:[#allocation7 + $0x50] sm:$0xff] %v318_v59  ;;  %430 = vst [vmem:[#allocation7 + $0xd0] sm:$0xff] %v382_v60  ;;  %v321_v3 = vadd.f32 %v530_v1, %v724_v24  ;;  %v385_v4 = vadd.f32 %v546_v2, %v724_v24  ;;  %v312_v5 = vpop.f32.mrb[11].mxu0  ;;  %v376_v6 = vpop.f32.mrb[11].mxu1 }
 0x12e   :  { %412 = vst [vmem:[#allocation7 + $0x40] sm:$0xff] %v310_v63  ;;  %428 = vst [vmem:[#allocation7 + $0xc0] sm:$0xff] %v374_v0  ;;  %v313_v7 = vadd.f32 %v724_v24, %v312_v5  ;;  %v377_v8 = vadd.f32 %v724_v24, %v376_v6 }
 0x12f   :  { %415 = vst [vmem:[#allocation7 + $0x58] sm:$0xff] %v321_v3  ;;  %431 = vst [vmem:[#allocation7 + $0xd8] sm:$0xff] %v385_v4 }
 0x130   :  { %413 = vst [vmem:[#allocation7 + $0x48] sm:$0xff] %v313_v7  ;;  %429 = vst [vmem:[#allocation7 + $0xc8] sm:$0xff] %v377_v8 }
 0x132   :  { %v533_v9 = vpop.f32.mrb[12].mxu0  ;;  %v549_v10 = vpop.f32.mrb[12].mxu1 }
 0x133   :  { %v334_v11 = vadd.f32 %v533_v9, %v724_v24  ;;  %v398_v12 = vadd.f32 %v549_v10, %v724_v24  ;;  %v325_v13 = vpop.f32.mrb[13].mxu0  ;;  %v389_v14 = vpop.f32.mrb[13].mxu1 }
 0x134   :  { %v326_v15 = vadd.f32 %v724_v24, %v325_v13  ;;  %v390_v16 = vadd.f32 %v724_v24, %v389_v14  ;;  %v534_v17 = vpop.f32.mrb[14].mxu0  ;;  %v550_v18 = vpop.f32.mrb[14].mxu1 }
 0x135   :  { %418 = vst [vmem:[#allocation7 + $0x70] sm:$0xff] %v334_v11  ;;  %434 = vst [vmem:[#allocation7 + $0xf0] sm:$0xff] %v398_v12  ;;  %v337_v19 = vadd.f32 %v534_v17, %v724_v24  ;;  %v401_v20 = vadd.f32 %v550_v18, %v724_v24  ;;  %v328_v21 = vpop.f32.mrb[15].mxu0  ;;  %v392_v22 = vpop.f32.mrb[15].mxu1 }
 0x136   :  { %416 = vst [vmem:[#allocation7 + $0x60] sm:$0xff] %v326_v15  ;;  %432 = vst [vmem:[#allocation7 + $0xe0] sm:$0xff] %v390_v16  ;;  %v329_v23 = vadd.f32 %v724_v24, %v328_v21  ;;  %v393_v25 = vadd.f32 %v724_v24, %v392_v22 }
 0x137   :  { %419 = vst [vmem:[#allocation7 + $0x78] sm:$0xff] %v337_v19  ;;  %435 = vst [vmem:[#allocation7 + $0xf8] sm:$0xff] %v401_v20 }
 0x138   :  { %417 = vst [vmem:[#allocation7 + $0x68] sm:$0xff] %v329_v23  ;;  %433 = vst [vmem:[#allocation7 + $0xe8] sm:$0xff] %v393_v25 }
 0x139   :  { %653 = shalt.err (!%p650_p6)
}
 0x13a   :  { %s654_s15 = scalar_lea.hbm %s773_s3, 4096 }
 0x13b   :  { %p655_p7 = scmp.ne.s32.totalorder %s773_s3, %s654_s15  ;;  %p658_p8 = scmp.lt.u32.totalorder %s654_s15, %s773_s3 }
 0x13d   :  { %p660_p9 = pnand %p658_p8, %p655_p7 }
 0x13f   :  { %663 = shalt.err (!%p660_p9)
}
 0x140   :  { %s675_s20 = smov 128   ;;  %s676_s21 = smov 8  }
 0x141   :  { %447 = dma.vmem_to_hbm [thread:$0]  %s442_s11, 4096, %s773_s3, [#allocation4], %s675_s20, %s675_s20, %s676_s21  }
 0x142   :  { %668 = dma.done.wait [#allocation4], 4096  }
 0x143   :  { %669 = vsyncadd [#allocation4], 4294963200 }
 0x144   :  { %451 = vsyncpa [#allocation3], 1 }
 0x145   :  { %452 = vsyncpa [#allocation6], 1 }
 0x146   :  { %453 = vsyncpa [#allocation4], 1 }

</bundles_post_ra>
